<compile_context>
chip_gen: v6e
topology: v6e:2x2x1
jax: 0.10.0
libtpu: 0.0.40
codegen_flags: <defaults>
</compile_context>

<pallas_src>
import functools

import jax
import jax.numpy as jnp
import numpy as np
from jax.experimental import pallas as pl
from jax.experimental.pallas import tpu as pltpu


def _round_up(n, m):
    return (n + m - 1) // m * m


def _bigram_kernel(ids_ref, emb_ref, logits_ref, nll_ref=None, *, chunk, compute_loss):
    """One token tile: gather embedding rows into logits, optionally per-token NLL."""
    tm, v = logits_ref.shape
    num_chunks = tm // chunk                                       # static

    emb = emb_ref[...]                                             # (V, V) f32, resident
    lane = jax.lax.broadcasted_iota(jnp.int32, (chunk, v), 1)      # hoisted out of loop

    def chunk_body(c, carry):
        start = pl.multiple_of(c * chunk, chunk)
        ids = ids_ref[pl.ds(start, chunk), :]                      # (chunk, 2) int32
        x_ids = ids[:, 0:1]                                        # (chunk, 1)

        # Row gather via one-hot @ table on the MXU (exact: one-hot is 0.0/1.0).
        one_hot = (lane == x_ids).astype(jnp.float32)              # (chunk, V)
        logits = jnp.dot(one_hot, emb,
                         preferred_element_type=jnp.float32)       # (chunk, V)
        logits_ref[pl.ds(start, chunk), :] = logits

        if compute_loss:
            tgt = ids[:, 1:2]                                      # (chunk, 1)
            m = jnp.max(logits, axis=-1, keepdims=True)
            lse = m + jnp.log(jnp.sum(jnp.exp(logits - m), axis=-1, keepdims=True))
            tgt_logit = jnp.sum(jnp.where(lane == tgt, logits, 0.0),
                                axis=-1, keepdims=True)
            # Raw per-token NLL; the mean (/BT) is applied once in the wrapper.
            nll_ref[pl.ds(start, chunk), :] = lse - tgt_logit
        return carry

    if num_chunks == 1:
        chunk_body(0, 0)
    else:
        # unroll=2: some scheduler overlap without spilling the 64-vreg register file
        # (each body holds ~48 live vregs of one-hot / logits / exp temporaries).
        jax.lax.fori_loop(0, num_chunks, chunk_body, 0, unroll=2)


def bigram_forward(x, emb, y=None, *, tm=4096):
    """Pallas equivalent of BiGramModel.forward(x, y)."""
    B, T = x.shape
    V = emb.shape[0]
    bt = B * T
    compute_loss = y is not None

    # ---- tile selection against an explicit VMEM budget (per chip generation) ------
    try:
        # 128 MiB on v5e/v6e, 64 MiB per TensorCore on v7x.
        vmem_phys = int(pltpu.get_tpu_info().vmem_capacity_bytes)
    except Exception:
        vmem_phys = 64 * 1024 * 1024                               # assume v7x worst case
    budget = int(vmem_phys * 0.55)                                 # pipeline/scratch headroom

    bt8 = _round_up(bt, 8)
    if bt8 <= 128:
        tm_eff = bt8                                               # tiny input: one small tile
    else:
        # double-buffered logits + ids + nll bytes per token row, plus resident table
        bytes_per_row = 2 * 4 * (V + 2 + 1)
        tm_cap = max(128, (budget - V * V * 4) // bytes_per_row)
        tm_eff = min(tm, tm_cap, _round_up(bt, 128))
        tm_eff = max(128, tm_eff // 128 * 128)                     # multiple of 128 rows
    chunk = min(128, tm_eff)                                       # bounds vreg live ranges
    num_tiles = pl.cdiv(bt, tm_eff)                                # ragged last tile is masked

    x_flat = x.reshape(bt).astype(jnp.int32)
    y_flat = (y.reshape(bt).astype(jnp.int32) if compute_loss
              else jnp.zeros((bt,), jnp.int32))
    ids = jnp.stack([x_flat, y_flat], axis=1)                      # (bt, 2): one DMA per step

    emb = emb.astype(jnp.float32)

    kernel = functools.partial(_bigram_kernel, chunk=chunk, compute_loss=compute_loss)

    # Outputs are written at their final shapes: no padded slab, no wrapper slice copy.
    out_shapes = [jax.ShapeDtypeStruct((bt, V), jnp.float32)]
    out_specs = [pl.BlockSpec((tm_eff, V), lambda i: (i, 0))]      # lane-dense logits slab
    if compute_loss:
        out_shapes.append(jax.ShapeDtypeStruct((bt, 1), jnp.float32))
        out_specs.append(pl.BlockSpec((tm_eff, 1), lambda i: (i, 0)))

    # Explicit scoped-VMEM limit (defaults are only ~16/32 MiB, well below physical).
    est_bytes = (2 * V * V * 4                # table (worst case if double-buffered)
                 + 2 * tm_eff * V * 4         # logits out, double-buffered
                 + 2 * tm_eff * 2 * 4         # ids in
                 + 2 * tm_eff * 4)            # nll out
    vmem_limit = int(min(vmem_phys * 9 // 10,
                         max(32 * 1024 * 1024, est_bytes * 3 // 2)))

    def run(single_buffer_table):
        if single_buffer_table:
            # Constant-index table: single-buffer it (halves its VMEM footprint).
            emb_spec = pl.BlockSpec((V, V), lambda i: (0, 0),
                                    pipeline_mode=pl.Buffered(1))
        else:
            emb_spec = pl.BlockSpec((V, V), lambda i: (0, 0))
        return pl.pallas_call(
            kernel,
            out_shape=tuple(out_shapes),
            grid_spec=pltpu.PrefetchScalarGridSpec(
                num_scalar_prefetch=0,
                grid=(num_tiles,),
                in_specs=[
                    pl.BlockSpec((tm_eff, 2), lambda i: (i, 0)),   # merged (x, y) ids tile
                    emb_spec,                                      # resident embedding table
                ],
                out_specs=tuple(out_specs),
            ),
            # Every output block is written by exactly one grid step -> safe to shard
            # the grid across TensorCores (v7x megacore); no-op on v5e/v6e.
            compiler_params=pltpu.CompilerParams(
                dimension_semantics=("parallel",),
                vmem_limit_bytes=vmem_limit),
        )(ids, emb)

    try:
        outs = run(True)
    except Exception:
        # Fallback for Pallas builds that reject buffer_count=1 single-buffering.
        outs = run(False)

    if compute_loss:
        logits_flat, nll = outs
        loss = jnp.sum(nll) / bt                                   # single scale, in wrapper
    else:
        (logits_flat,) = outs
        loss = None

    logits = logits_flat.reshape(B, T, V)                          # metadata-only reshape
    return logits, loss


if __name__ == "__main__":
    V = 128      # vocab_size
    B, T = 2, 8  # batch, sequence length

    key = jax.random.PRNGKey(0)
    k_emb, k_x, k_y = jax.random.split(key, 3)

    # nn.Embedding(vocab_size, vocab_size) default init ~ N(0, 1)
    emb = jax.random.normal(k_emb, (V, V), dtype=jnp.float32)
    x = jax.random.randint(k_x, (B, T), 0, V, dtype=jnp.int32)
    y = jax.random.randint(k_y, (B, T), 0, V, dtype=jnp.int32)

    # Pure-JAX reference (embedding lookup + mean cross-entropy).
    def ref_forward(x_, emb_, y_=None):
        ref_logits = emb_[x_]                                      # (B, T, V)
        if y_ is None:
            return ref_logits, None
        logp = jax.nn.log_softmax(ref_logits.reshape(-1, V), axis=-1)
        nll = -logp[jnp.arange(x_.size), y_.reshape(-1)]
        return ref_logits, jnp.mean(nll)

    logits, loss = bigram_forward(x, emb, y)
    jax.block_until_ready((logits, loss))
    ref_logits, ref_loss = ref_forward(x, emb, y)
    np.testing.assert_allclose(np.asarray(logits), np.asarray(ref_logits),
                               rtol=1e-5, atol=1e-5)
    np.testing.assert_allclose(np.asarray(loss), np.asarray(ref_loss),
                               rtol=1e-5, atol=1e-5)

    # y=None inference path: logits-only kernel variant, returns (logits, None).
    logits_only, none_loss = bigram_forward(x, emb, None)
    jax.block_until_ready(logits_only)
    assert none_loss is None
    np.testing.assert_allclose(np.asarray(logits_only), np.asarray(ref_logits),
                               rtol=1e-5, atol=1e-5)

    # Multi-tile + ragged-final-block path (bt=280 with 128-row tiles): exercises the
    # "parallel" multi-step grid, the constant-index table reuse across steps, and the
    # masked writeback of the partial last block (no wrapper slice copy anywhere).
    B2, T2 = 4, 70
    k_x2, k_y2 = jax.random.split(jax.random.PRNGKey(1))
    x2 = jax.random.randint(k_x2, (B2, T2), 0, V, dtype=jnp.int32)
    y2 = jax.random.randint(k_y2, (B2, T2), 0, V, dtype=jnp.int32)
    logits2, loss2 = bigram_forward(x2, emb, y2, tm=128)
    jax.block_until_ready((logits2, loss2))
    ref_logits2, ref_loss2 = ref_forward(x2, emb, y2)
    np.testing.assert_allclose(np.asarray(logits2), np.asarray(ref_logits2),
                               rtol=1e-5, atol=1e-5)
    np.testing.assert_allclose(np.asarray(loss2), np.asarray(ref_loss2),
                               rtol=1e-5, atol=1e-5)

    print("KERNEL_OK")
</pallas_src>

<mosaic_0001>
module attributes {stable_mosaic.version = 11 : i64} {
  func.func @_bigram_kernel(%arg0: i32, %arg1: memref<16x2xi32, #tpu.memory_space<vmem>>, %arg2: memref<128x128xf32, #tpu.memory_space<vmem>>, %arg3: memref<16x128xf32, #tpu.memory_space<vmem>>, %arg4: memref<16x1xf32, #tpu.memory_space<vmem>>) attributes {dimension_semantics = [#tpu.dimension_semantics<parallel>], iteration_bounds = array<i64: 1>, scalar_prefetch = 0 : i64, scratch_operands = 0 : i64, tpu.core_type = #tpu.core_type<tc>, window_params = [{transform_indices = @transform_0, window_bounds = array<i64: 16, 2>}, {pipeline_mode = #tpu.pipeline_mode<synchronous>, transform_indices = @transform_1, window_bounds = array<i64: 128, 128>}, {transform_indices = @transform_2, window_bounds = array<i64: 16, 128>}, {transform_indices = @transform_3, window_bounds = array<i64: 16, 1>}]} {
    %c0 = arith.constant 0 : index
    %c0_0 = arith.constant 0 : index
    %0 = vector.load %arg2[%c0, %c0_0] : memref<128x128xf32, #tpu.memory_space<vmem>>, vector<128x128xf32>
    %1 = tpu.iota {dimensions = array<i32: 1>} : vector<16x128xi32>
    %c0_i32 = arith.constant 0 : i32
    %2 = tpu.assume_multiple %c0_i32, 16 : i32
    %3 = arith.index_cast %2 : i32 to index
    %c0_1 = arith.constant 0 : index
    %4 = vector.load %arg1[%3, %c0_1] : memref<16x2xi32, #tpu.memory_space<vmem>>, vector<16x2xi32>
    %5 = vector.extract_strided_slice %4 {offsets = [0, 0], sizes = [16, 1], strides = [1, 1]} : vector<16x2xi32> to vector<16x1xi32>
    %6 = vector.broadcast %5 : vector<16x1xi32> to vector<16x128xi32>
    %7 = arith.cmpi eq, %1, %6 : vector<16x128xi32>
    %8 = arith.extui %7 : vector<16x128xi1> to vector<16x128xi32>
    %9 = arith.sitofp %8 : vector<16x128xi32> to vector<16x128xf32>
    %cst = arith.constant dense<0.000000e+00> : vector<16x128xf32>
    %10 = tpu.matmul %9, %0, %cst {dimension_numbers = #tpu.dot_dimension_numbers<[1], [0], [0], [1], [0, 0, 1, 1], [], []>} : vector<16x128xf32>, vector<128x128xf32>, vector<16x128xf32> -> vector<16x128xf32>
    %11 = arith.index_cast %2 : i32 to index
    %c0_2 = arith.constant 0 : index
    %12 = vector.load %arg3[%11, %c0_2] : memref<16x128xf32, #tpu.memory_space<vmem>>, vector<16x128xf32>
    tpu.vector_store %arg3[%11, %c0_2], %10 {strides = array<i32>} : memref<16x128xf32, #tpu.memory_space<vmem>>, vector<16x128xf32>,
    %13 = vector.extract_strided_slice %4 {offsets = [0, 1], sizes = [16, 1], strides = [1, 1]} : vector<16x2xi32> to vector<16x1xi32>
    %cst_3 = arith.constant dense<0xFF800000> : vector<16xf32>
    %14 = vector.multi_reduction <maximumf>, %10, %cst_3 [1] : vector<16x128xf32> to vector<16xf32>
    %15 = vector.shape_cast %14 : vector<16xf32> to vector<16x1xf32>
    %16 = vector.broadcast %15 : vector<16x1xf32> to vector<16x128xf32>
    %17 = arith.subf %10, %16 : vector<16x128xf32>
    %18 = math.exp %17 : vector<16x128xf32>
    %cst_4 = arith.constant dense<0.000000e+00> : vector<16xf32>
    %19 = vector.multi_reduction <add>, %18, %cst_4 [1] : vector<16x128xf32> to vector<16xf32>
    %20 = vector.shape_cast %19 : vector<16xf32> to vector<16x1xf32>
    %21 = math.log %20 : vector<16x1xf32>
    %22 = arith.addf %15, %21 : vector<16x1xf32>
    %23 = vector.broadcast %13 : vector<16x1xi32> to vector<16x128xi32>
    %24 = arith.cmpi eq, %1, %23 : vector<16x128xi32>
    %cst_5 = arith.constant 0.000000e+00 : f32
    %25 = vector.broadcast %cst_5 : f32 to vector<16x128xf32>
    %26 = arith.select %24, %10, %25 : vector<16x128xi1>, vector<16x128xf32>
    %cst_6 = arith.constant dense<0.000000e+00> : vector<16xf32>
    %27 = vector.multi_reduction <add>, %26, %cst_6 [1] : vector<16x128xf32> to vector<16xf32>
    %28 = vector.shape_cast %27 : vector<16xf32> to vector<16x1xf32>
    %29 = arith.subf %22, %28 : vector<16x1xf32>
    %30 = arith.index_cast %2 : i32 to index
    %c0_7 = arith.constant 0 : index
    %31 = vector.load %arg4[%30, %c0_7] : memref<16x1xf32, #tpu.memory_space<vmem>>, vector<16x1xf32>
    tpu.vector_store %arg4[%30, %c0_7], %29 {strides = array<i32>} : memref<16x1xf32, #tpu.memory_space<vmem>>, vector<16x1xf32>,
    return
  }
  func.func @transform_0(%arg0: i32) -> (i32, i32) {
    %c0_i32 = arith.constant 0 : i32
    %c0_i32_0 = arith.constant 0 : i32
    return %arg0, %c0_i32 : i32, i32
  }
  func.func @transform_1(%arg0: i32) -> (i32, i32) {
    %c0_i32 = arith.constant 0 : i32
    %c0_i32_0 = arith.constant 0 : i32
    %c0_i32_1 = arith.constant 0 : i32
    return %c0_i32, %c0_i32_0 : i32, i32
  }
  func.func @transform_2(%arg0: i32) -> (i32, i32) {
    %c0_i32 = arith.constant 0 : i32
    %c0_i32_0 = arith.constant 0 : i32
    return %arg0, %c0_i32 : i32, i32
  }
  func.func @transform_3(%arg0: i32) -> (i32, i32) {
    %c0_i32 = arith.constant 0 : i32
    %c0_i32_0 = arith.constant 0 : i32
    return %arg0, %c0_i32 : i32, i32
  }
}

module attributes {stable_mosaic.version = 11 : i64} {
  func.func @_bigram_kernel(%arg0: i32, %arg1: memref<16x2xi32, #tpu.memory_space<vmem>>, %arg2: memref<128x128xf32, #tpu.memory_space<vmem>>, %arg3: memref<16x128xf32, #tpu.memory_space<vmem>>, %arg4: memref<16x1xf32, #tpu.memory_space<vmem>>) attributes {dimension_semantics = [#tpu.dimension_semantics<parallel>], iteration_bounds = array<i64: 1>, scalar_prefetch = 0 : i64, scratch_operands = 0 : i64, tpu.core_type = #tpu.core_type<tc>, window_params = [{transform_indices = @transform_0, window_bounds = array<i64: 16, 2>}, {pipeline_mode = #tpu.pipeline_mode<synchronous>, transform_indices = @transform_1, window_bounds = array<i64: 128, 128>}, {transform_indices = @transform_2, window_bounds = array<i64: 16, 128>}, {transform_indices = @transform_3, window_bounds = array<i64: 16, 1>}]} {
    %c0 = arith.constant 0 : index
    %c0_0 = arith.constant 0 : index
    %0 = vector.load %arg2[%c0, %c0_0] : memref<128x128xf32, #tpu.memory_space<vmem>>, vector<128x128xf32>
    %1 = tpu.iota {dimensions = array<i32: 1>} : vector<16x128xi32>
    %c0_i32 = arith.constant 0 : i32
    %2 = tpu.assume_multiple %c0_i32, 16 : i32
    %3 = arith.index_cast %2 : i32 to index
    %c0_1 = arith.constant 0 : index
    %4 = vector.load %arg1[%3, %c0_1] : memref<16x2xi32, #tpu.memory_space<vmem>>, vector<16x2xi32>
    %5 = vector.extract_strided_slice %4 {offsets = [0, 0], sizes = [16, 1], strides = [1, 1]} : vector<16x2xi32> to vector<16x1xi32>
    %6 = vector.broadcast %5 : vector<16x1xi32> to vector<16x128xi32>
    %7 = arith.cmpi eq, %1, %6 : vector<16x128xi32>
    %8 = arith.extui %7 : vector<16x128xi1> to vector<16x128xi32>
    %9 = arith.sitofp %8 : vector<16x128xi32> to vector<16x128xf32>
    %cst = arith.constant dense<0.000000e+00> : vector<16x128xf32>
    %10 = tpu.matmul %9, %0, %cst {dimension_numbers = #tpu.dot_dimension_numbers<[1], [0], [0], [1], [0, 0, 1, 1], [], []>} : vector<16x128xf32>, vector<128x128xf32>, vector<16x128xf32> -> vector<16x128xf32>
    %11 = arith.index_cast %2 : i32 to index
    %c0_2 = arith.constant 0 : index
    %12 = vector.load %arg3[%11, %c0_2] : memref<16x128xf32, #tpu.memory_space<vmem>>, vector<16x128xf32>
    tpu.vector_store %arg3[%11, %c0_2], %10 {strides = array<i32>} : memref<16x128xf32, #tpu.memory_space<vmem>>, vector<16x128xf32>,
    %13 = vector.extract_strided_slice %4 {offsets = [0, 1], sizes = [16, 1], strides = [1, 1]} : vector<16x2xi32> to vector<16x1xi32>
    %cst_3 = arith.constant dense<0xFF800000> : vector<16xf32>
    %14 = vector.multi_reduction <maximumf>, %10, %cst_3 [1] : vector<16x128xf32> to vector<16xf32>
    %15 = vector.shape_cast %14 : vector<16xf32> to vector<16x1xf32>
    %16 = vector.broadcast %15 : vector<16x1xf32> to vector<16x128xf32>
    %17 = arith.subf %10, %16 : vector<16x128xf32>
    %18 = math.exp %17 : vector<16x128xf32>
    %cst_4 = arith.constant dense<0.000000e+00> : vector<16xf32>
    %19 = vector.multi_reduction <add>, %18, %cst_4 [1] : vector<16x128xf32> to vector<16xf32>
    %20 = vector.shape_cast %19 : vector<16xf32> to vector<16x1xf32>
    %21 = math.log %20 : vector<16x1xf32>
    %22 = arith.addf %15, %21 : vector<16x1xf32>
    %23 = vector.broadcast %13 : vector<16x1xi32> to vector<16x128xi32>
    %24 = arith.cmpi eq, %1, %23 : vector<16x128xi32>
    %cst_5 = arith.constant 0.000000e+00 : f32
    %25 = vector.broadcast %cst_5 : f32 to vector<16x128xf32>
    %26 = arith.select %24, %10, %25 : vector<16x128xi1>, vector<16x128xf32>
    %cst_6 = arith.constant dense<0.000000e+00> : vector<16xf32>
    %27 = vector.multi_reduction <add>, %26, %cst_6 [1] : vector<16x128xf32> to vector<16xf32>
    %28 = vector.shape_cast %27 : vector<16xf32> to vector<16x1xf32>
    %29 = arith.subf %22, %28 : vector<16x1xf32>
    %30 = arith.index_cast %2 : i32 to index
    %c0_7 = arith.constant 0 : index
    %31 = vector.load %arg4[%30, %c0_7] : memref<16x1xf32, #tpu.memory_space<vmem>>, vector<16x1xf32>
    tpu.vector_store %arg4[%30, %c0_7], %29 {strides = array<i32>} : memref<16x1xf32, #tpu.memory_space<vmem>>, vector<16x1xf32>,
    return
  }
  func.func @transform_0(%arg0: i32) -> (i32, i32) {
    %c0_i32 = arith.constant 0 : i32
    %c0_i32_0 = arith.constant 0 : i32
    return %arg0, %c0_i32 : i32, i32
  }
  func.func @transform_1(%arg0: i32) -> (i32, i32) {
    %c0_i32 = arith.constant 0 : i32
    %c0_i32_0 = arith.constant 0 : i32
    %c0_i32_1 = arith.constant 0 : i32
    return %c0_i32, %c0_i32_0 : i32, i32
  }
  func.func @transform_2(%arg0: i32) -> (i32, i32) {
    %c0_i32 = arith.constant 0 : i32
    %c0_i32_0 = arith.constant 0 : i32
    return %arg0, %c0_i32 : i32, i32
  }
  func.func @transform_3(%arg0: i32) -> (i32, i32) {
    %c0_i32 = arith.constant 0 : i32
    %c0_i32_0 = arith.constant 0 : i32
    return %arg0, %c0_i32 : i32, i32
  }
}

</mosaic_0001>

<bundles_post_ra>
// kernel: tpu_custom_call.1
= control target key start
LH: loop header
LB: loop body
LE: loop exit
PB: predicated region body
PF: predicated region fallthrough
CT: control target
= control target key end

     0   :  { %9 = vsyncpa [#allocation3], 0  ;;  %s371_s0 = inlined_call_operand.vmem [shape: s32[16,2], index: 0, kind: input, shape index: {}]   ;;  %s372_s1 = inlined_call_operand.hbm [shape: f32[128,128], index: 1, kind: input, shape index: {}]   ;;  %s373_s2 = inlined_call_operand.hbm [shape: f32[16,128], index: 2, kind: output, shape index: {0}]   ;;  %s374_s3 = inlined_call_operand.vmem [shape: f32[16,1], index: 3, kind: output, shape index: {1}]  }
   0x1   :  { %10 = vsyncpa [#allocation4], 0  ;;  %s316_s12 = smov [#allocation2]  }
   0x2   :  { %s18_s13 = sshll.u32 %s316_s12, 4  ;;  %s19_s13 = int_to_ptr.vmem [resolvable:$true] %s18_s13 }
   0x3   :  { %s280_s14 = scalar_lea.vmem %s19_s13, 2048  ;;  %p285_p1 = scmp.lt.s32.totalorder %s19_s13, %s19_s13 }
   0x4   :  { %p281_p0 = scmp.ne.s32.totalorder %s19_s13, %s280_s14  ;;  %p286_p2 = scmp.lt.s32.totalorder %s280_s14, %s280_s14 }
   0x6   :  { %p287_p3 = por %p286_p2, %p285_p1 }
   0x8   :  { %p288_p4 = pnand %p287_p3, %p281_p0 }
   0xa   :  { %291 = shalt.err (!%p288_p4)
}
   0xb   :  { %s317_s15 = smov 128   ;;  %s318_s16 = smov 8  }
   0xc   :  { %24 = dma.hbm_to_vmem [thread:$0]  %s372_s1, 2048, %s19_s13, [#allocation3], %s317_s15, %s317_s15, %s318_s16  }
   0xd   :  { %312 = dma.done.wait [#allocation3], 2048  }
   0xe   :  { %313 = vsyncadd [#allocation3], 4294965248  ;;  %v319_v0 = vmov 0   ;;  %v46_v1 = vld [vmem:[%s371_s0] sm:$0xff]  ;;  %v43_v2 = vld [vmem:[#allocation2 + $0x78] sm:$0xff]  ;;  %v320_v6 = vmov 1   ;;  %v44_v20 = vlaneseq }
   0xf   :  { %261 = vset.pattern.permute.xlu0 %v319_v0  ;;  %219 = vmatprep.subr.mxu0 %v43_v2  ;;  %v42_v3 = vld [vmem:[#allocation2 + $0x70] sm:$0xff]  ;;  %v355_v4 = vld [vmem:[%s371_s0 + $0x8] sm:$0xff]  ;;  %v40_v7 = vld [vmem:[#allocation2 + $0x60] sm:$0xff]  ;;  %v321_v23 = vmov 1.0   ;;  %s322_s0 = smov [#allocation5]  }
  0x10   :  { %49 = vperm.xlu0 %261, %v46_v1   ;;  %220 = vmatpush3.msra.mxu0 %v43_v2  ;;  %v41_v5 = vld [vmem:[#allocation2 + $0x68] sm:$0xff]  ;;  %v39_v8 = vld [vmem:[#allocation2 + $0x58] sm:$0xff]  ;;  %v38_v9 = vld [vmem:[#allocation2 + $0x50] sm:$0xff]  ;;  %v45_v21 = vand.u32 127, %v44_v20  ;;  %s181_s1 = sshll.u32 %s322_s0, 4  ;;  %s182_s1 = int_to_ptr.vmem [resolvable:$true] %s181_s1 }
  0x11   :  { %221 = vmatprep.subr.mxu0 %v42_v3  ;;  %263 = vset.pattern.permute.xlu1 %v320_v6  ;;  %v37_v10 = vld [vmem:[#allocation2 + $0x48] sm:$0xff]  ;;  %v36_v11 = vld [vmem:[#allocation2 + $0x40] sm:$0xff]  ;;  %v35_v12 = vld [vmem:[#allocation2 + $0x38] sm:$0xff]  ;;  %s292_s23 = scalar_lea.vmem %s182_s1, 256  ;;  %p297_p6 = scmp.lt.s32.totalorder %s182_s1, %s182_s1 }
  0x12   :  { %222 = vmatpush3.msra.mxu0 %v42_v3  ;;  %v34_v13 = vld [vmem:[#allocation2 + $0x30] sm:$0xff]  ;;  %v33_v14 = vld [vmem:[#allocation2 + $0x28] sm:$0xff]  ;;  %v32_v15 = vld [vmem:[#allocation2 + $0x20] sm:$0xff]  ;;  %p293_p5 = scmp.ne.s32.totalorder %s182_s1, %s292_s23  ;;  %p298_p7 = scmp.lt.s32.totalorder %s292_s23, %s292_s23 }
  0x13   :  { %223 = vmatprep.subr.mxu0 %v41_v5  ;;  %v31_v16 = vld [vmem:[#allocation2 + $0x18] sm:$0xff]  ;;  %v30_v17 = vld [vmem:[#allocation2 + $0x10] sm:$0xff]  ;;  %v29_v18 = vld [vmem:[#allocation2 + $0x8] sm:$0xff] }
  0x14   :  { %52 = vperm.xlu0 %261, %v355_v4   ;;  %224 = vmatpush3.msra.mxu0 %v41_v5  ;;  %v28_v19 = vld [vmem:[#allocation2] sm:$0xff]  ;;  %p299_p8 = por %p298_p7, %p297_p6 }
  0x15   :  { %225 = vmatprep.subr.mxu0 %v40_v7 }
  0x16   :  { %226 = vmatpush3.msra.mxu0 %v40_v7  ;;  %p300_p9 = pnand %p299_p8, %p293_p5 }
  0x17   :  { %227 = vmatprep.subr.mxu0 %v39_v8 }
  0x18   :  { %262 = vset.pattern.permute.xlu0 %v320_v6  ;;  %228 = vmatpush3.msra.mxu0 %v39_v8 }
  0x19   :  { %158 = vperm.xlu0 %262, %v46_v1   ;;  %229 = vmatprep.subr.mxu0 %v38_v9 }
  0x1a   :  { %230 = vmatpush3.msra.mxu0 %v38_v9 }
  0x1b   :  { %231 = vmatprep.subr.mxu0 %v37_v10 }
  0x1c   :  { %232 = vmatpush3.msra.mxu0 %v37_v10 }
  0x1d   :  { %233 = vmatprep.subr.mxu0 %v36_v11 }
  0x1e   :  { %234 = vmatpush3.msra.mxu0 %v36_v11 }
  0x1f   :  { %235 = vmatprep.subr.mxu0 %v35_v12 }
  0x20   :  { %236 = vmatpush3.msra.mxu0 %v35_v12 }
  0x21   :  { %237 = vmatprep.subr.mxu0 %v34_v13 }
  0x22   :  { %238 = vmatpush3.msra.mxu0 %v34_v13 }
  0x23   :  { %239 = vmatprep.subr.mxu0 %v33_v14 }
  0x24   :  { %240 = vmatpush3.msra.mxu0 %v33_v14 }
  0x25   :  { %241 = vmatprep.subr.mxu0 %v32_v15 }
  0x26   :  { %242 = vmatpush3.msra.mxu0 %v32_v15 }
  0x27   :  { %243 = vmatprep.subr.mxu0 %v31_v16 }
  0x28   :  { %244 = vmatpush3.msra.mxu0 %v31_v16 }
  0x29   :  { %245 = vmatprep.subr.mxu0 %v30_v17 }
  0x2a   :  { %246 = vmatpush3.msra.mxu0 %v30_v17 }
  0x2b   :  { %247 = vmatprep.subr.mxu0 %v29_v18 }
  0x2c   :  { %248 = vmatpush3.msra.mxu0 %v29_v18 }
  0x2d   :  { %249 = vmatprep.subr.mxu0 %v28_v19 }
  0x2e   :  { %250 = vmatpush3.msra.mxu0 %v28_v19 }
  0x8b   :  { %v50_v22 = vpop.permute.xlu0 %49 }
  0x8c   :  { %vm54_vm0 = vcmp.eq.s32.totalorder %v45_v21, %v50_v22 }
  0x8d   :  { %251 = vmatprep.mubr.msk.f32.mxu0 %vm54_vm0, %v321_v23 }
  0x8f   :  { %v53_v24 = vpop.permute.xlu0 %52 }
  0x90   :  { %vm55_vm1 = vcmp.eq.s32.totalorder %v45_v21, %v53_v24 }
  0x91   :  { %252 = vmatmul.mubr.msk.f32.vlgmr.msra.gmra.mxu0 %vm55_vm1, %v321_v23 }
  0x94   :  { %v159_v33 = vpop.permute.xlu0 %158 }
  0x95   :  { %vm163_vm2 = vcmp.eq.s32.totalorder %v45_v21, %v159_v33 }
 0x151   :  { %v253_v25 = vpop.f32.mrf.mxu0 }
 0x152   :  { %136 = vst [vmem:[#allocation5 + $0x8] sm:$0xff] %v253_v25 }
 0x153   :  { %v126_v26 = vpop.f32.mrf.mxu0 }
 0x154   :  { %135 = vst [vmem:[#allocation5] sm:$0xff] %v126_v26  ;;  %137 = vmax.xlane.f32.xlu1 %v126_v26  ;;  %v165_v37 = vsel %vm163_vm2, %v126_v26, 0.0 }
 0x158   :  { %139 = vmax.xlane.f32.xlu1 %v253_v25 }
 0x169   :  { %161 = vperm.xlu1 %263, %v355_v4  }
 0x1dd   :  { %v138_v27 = vpop.xlane.xlu1 %137 }
 0x1de   :  { %v141_v28 = vsub.f32 %v126_v26, %v138_v27 }
 0x1e0   :  { %v143_v29 = vmul.f32 1.442695, %v141_v28 }
 0x1e1   :  { %v140_v30 = vpop.xlane.xlu1 %139 }
 0x1e2   :  { %264 = vpow2.f32 %v143_v29  ;;  %v142_v31 = vsub.f32 %v253_v25, %v140_v30 }
 0x1e4   :  { %v145_v32 = vmul.f32 1.442695, %v142_v31 }
 0x1e5   :  { %v162_v35 = vpop.permute.xlu1 %161 }
 0x1e6   :  { %266 = vpow2.f32 %v145_v32  ;;  %vm164_vm3 = vcmp.eq.s32.totalorder %v45_v21, %v162_v35 }
 0x1e7   :  { %v166_v38 = vsel %vm164_vm3, %v253_v25, 0.0 }
 0x1ef   :  { %v265_v34 = vpop.eup %264 }
 0x1f0   :  { %147 = vadd.xlane.f32.xlu0 %v265_v34 }
 0x1f3   :  { %v267_v36 = vpop.eup %266 }
 0x1f4   :  { %149 = vadd.xlane.f32.xlu1 %v267_v36  ;;  %167 = vadd.xlane.f32.xlu0 %v165_v37 }
 0x1f8   :  { %169 = vadd.xlane.f32.xlu0 %v166_v38 }
 0x1f9   :  { %303 = shalt.err (!%p300_p9)
}
 0x1fa   :  { %187 = dma.vmem_to_hbm [thread:$0]  %s182_s1, 256, %s373_s2, [#allocation4], %s317_s15, %s317_s15, %s318_s16   ;;  %vm173_vm4 = vcmask 7168  }
 0x279   :  { %v148_v39 = vpop.xlane.xlu0 %147 }
 0x27a   :  { %268 = vlog2.f32 %v148_v39 }
 0x27d   :  { %v150_v40 = vpop.xlane.xlu1 %149  ;;  %v168_v43 = vpop.xlane.xlu0 %167 }
 0x27e   :  { %270 = vlog2.f32 %v150_v40 }
 0x281   :  { %v170_v49 = vpop.xlane.xlu0 %169 }
 0x287   :  { %v269_v41 = vpop.eup %268 }
 0x288   :  { %v152_v42 = vmul.f32 0.6931472, %v269_v41 }
 0x28a   :  { %v155_v44 = vadd.f32 %v152_v42, %v138_v27 }
 0x28b   :  { %v271_v45 = vpop.eup %270 }
 0x28c   :  { %v154_v46 = vmul.f32 0.6931472, %v271_v45  ;;  %v171_v47 = vsub.f32 %v155_v44, %v168_v43 }
 0x28e   :  { %174 = vst.msk [vmem:[%s374_s3] sm:$0xff] %vm173_vm4, %v171_v47  ;;  %v156_v48 = vadd.f32 %v154_v46, %v140_v30 }
 0x290   :  { %v172_v50 = vsub.f32 %v156_v48, %v170_v49 }
 0x292   :  { %175 = vst.msk [vmem:[%s374_s3 + $0x8] sm:$0xff] %vm173_vm4, %v172_v50 }
 0x293   :  { %314 = dma.done.wait [#allocation4], 256  }
 0x294   :  { %315 = vsyncadd [#allocation4], 4294967040 }
 0x295   :  { %195 = vsyncpa [#allocation3], 1 }
 0x296   :  { %196 = vsyncpa [#allocation4], 1 }

// kernel: tpu_custom_call.1
= control target key start
LH: loop header
LB: loop body
LE: loop exit
PB: predicated region body
PF: predicated region fallthrough
CT: control target
= control target key end

     0   :  { %9 = vsyncpa [#allocation3], 0  ;;  %s371_s0 = inlined_call_operand.vmem [shape: s32[16,2], index: 0, kind: input, shape index: {}]   ;;  %s372_s1 = inlined_call_operand.hbm [shape: f32[128,128], index: 1, kind: input, shape index: {}]   ;;  %s373_s2 = inlined_call_operand.hbm [shape: f32[16,128], index: 2, kind: output, shape index: {0}]   ;;  %s374_s3 = inlined_call_operand.vmem [shape: f32[16,1], index: 3, kind: output, shape index: {1}]  }
   0x1   :  { %10 = vsyncpa [#allocation4], 0  ;;  %s316_s12 = smov [#allocation2]  }
   0x2   :  { %s18_s13 = sshll.u32 %s316_s12, 4  ;;  %s19_s13 = int_to_ptr.vmem [resolvable:$true] %s18_s13 }
   0x3   :  { %s280_s14 = scalar_lea.vmem %s19_s13, 2048  ;;  %p285_p1 = scmp.lt.s32.totalorder %s19_s13, %s19_s13 }
   0x4   :  { %p281_p0 = scmp.ne.s32.totalorder %s19_s13, %s280_s14  ;;  %p286_p2 = scmp.lt.s32.totalorder %s280_s14, %s280_s14 }
   0x6   :  { %p287_p3 = por %p286_p2, %p285_p1 }
   0x8   :  { %p288_p4 = pnand %p287_p3, %p281_p0 }
   0xa   :  { %291 = shalt.err (!%p288_p4)
}
   0xb   :  { %s317_s15 = smov 128   ;;  %s318_s16 = smov 8  }
   0xc   :  { %24 = dma.hbm_to_vmem [thread:$0]  %s372_s1, 2048, %s19_s13, [#allocation3], %s317_s15, %s317_s15, %s318_s16  }
   0xd   :  { %312 = dma.done.wait [#allocation3], 2048  }
   0xe   :  { %313 = vsyncadd [#allocation3], 4294965248  ;;  %v319_v0 = vmov 0   ;;  %v46_v1 = vld [vmem:[%s371_s0] sm:$0xff]  ;;  %v43_v2 = vld [vmem:[#allocation2 + $0x78] sm:$0xff]  ;;  %v320_v6 = vmov 1   ;;  %v44_v20 = vlaneseq }
   0xf   :  { %261 = vset.pattern.permute.xlu0 %v319_v0  ;;  %219 = vmatprep.subr.mxu0 %v43_v2  ;;  %v42_v3 = vld [vmem:[#allocation2 + $0x70] sm:$0xff]  ;;  %v355_v4 = vld [vmem:[%s371_s0 + $0x8] sm:$0xff]  ;;  %v40_v7 = vld [vmem:[#allocation2 + $0x60] sm:$0xff]  ;;  %v321_v23 = vmov 1.0   ;;  %s322_s0 = smov [#allocation5]  }
  0x10   :  { %49 = vperm.xlu0 %261, %v46_v1   ;;  %220 = vmatpush3.msra.mxu0 %v43_v2  ;;  %v41_v5 = vld [vmem:[#allocation2 + $0x68] sm:$0xff]  ;;  %v39_v8 = vld [vmem:[#allocation2 + $0x58] sm:$0xff]  ;;  %v38_v9 = vld [vmem:[#allocation2 + $0x50] sm:$0xff]  ;;  %v45_v21 = vand.u32 127, %v44_v20  ;;  %s181_s1 = sshll.u32 %s322_s0, 4  ;;  %s182_s1 = int_to_ptr.vmem [resolvable:$true] %s181_s1 }
  0x11   :  { %221 = vmatprep.subr.mxu0 %v42_v3  ;;  %263 = vset.pattern.permute.xlu1 %v320_v6  ;;  %v37_v10 = vld [vmem:[#allocation2 + $0x48] sm:$0xff]  ;;  %v36_v11 = vld [vmem:[#allocation2 + $0x40] sm:$0xff]  ;;  %v35_v12 = vld [vmem:[#allocation2 + $0x38] sm:$0xff]  ;;  %s292_s23 = scalar_lea.vmem %s182_s1, 256  ;;  %p297_p6 = scmp.lt.s32.totalorder %s182_s1, %s182_s1 }
  0x12   :  { %222 = vmatpush3.msra.mxu0 %v42_v3  ;;  %v34_v13 = vld [vmem:[#allocation2 + $0x30] sm:$0xff]  ;;  %v33_v14 = vld [vmem:[#allocation2 + $0x28] sm:$0xff]  ;;  %v32_v15 = vld [vmem:[#allocation2 + $0x20] sm:$0xff]  ;;  %p293_p5 = scmp.ne.s32.totalorder %s182_s1, %s292_s23  ;;  %p298_p7 = scmp.lt.s32.totalorder %s292_s23, %s292_s23 }
  0x13   :  { %223 = vmatprep.subr.mxu0 %v41_v5  ;;  %v31_v16 = vld [vmem:[#allocation2 + $0x18] sm:$0xff]  ;;  %v30_v17 = vld [vmem:[#allocation2 + $0x10] sm:$0xff]  ;;  %v29_v18 = vld [vmem:[#allocation2 + $0x8] sm:$0xff] }
  0x14   :  { %52 = vperm.xlu0 %261, %v355_v4   ;;  %224 = vmatpush3.msra.mxu0 %v41_v5  ;;  %v28_v19 = vld [vmem:[#allocation2] sm:$0xff]  ;;  %p299_p8 = por %p298_p7, %p297_p6 }
  0x15   :  { %225 = vmatprep.subr.mxu0 %v40_v7 }
  0x16   :  { %226 = vmatpush3.msra.mxu0 %v40_v7  ;;  %p300_p9 = pnand %p299_p8, %p293_p5 }
  0x17   :  { %227 = vmatprep.subr.mxu0 %v39_v8 }
  0x18   :  { %262 = vset.pattern.permute.xlu0 %v320_v6  ;;  %228 = vmatpush3.msra.mxu0 %v39_v8 }
  0x19   :  { %158 = vperm.xlu0 %262, %v46_v1   ;;  %229 = vmatprep.subr.mxu0 %v38_v9 }
  0x1a   :  { %230 = vmatpush3.msra.mxu0 %v38_v9 }
  0x1b   :  { %231 = vmatprep.subr.mxu0 %v37_v10 }
  0x1c   :  { %232 = vmatpush3.msra.mxu0 %v37_v10 }
  0x1d   :  { %233 = vmatprep.subr.mxu0 %v36_v11 }
  0x1e   :  { %234 = vmatpush3.msra.mxu0 %v36_v11 }
  0x1f   :  { %235 = vmatprep.subr.mxu0 %v35_v12 }
  0x20   :  { %236 = vmatpush3.msra.mxu0 %v35_v12 }
  0x21   :  { %237 = vmatprep.subr.mxu0 %v34_v13 }
  0x22   :  { %238 = vmatpush3.msra.mxu0 %v34_v13 }
  0x23   :  { %239 = vmatprep.subr.mxu0 %v33_v14 }
  0x24   :  { %240 = vmatpush3.msra.mxu0 %v33_v14 }
  0x25   :  { %241 = vmatprep.subr.mxu0 %v32_v15 }
  0x26   :  { %242 = vmatpush3.msra.mxu0 %v32_v15 }
  0x27   :  { %243 = vmatprep.subr.mxu0 %v31_v16 }
  0x28   :  { %244 = vmatpush3.msra.mxu0 %v31_v16 }
  0x29   :  { %245 = vmatprep.subr.mxu0 %v30_v17 }
  0x2a   :  { %246 = vmatpush3.msra.mxu0 %v30_v17 }
  0x2b   :  { %247 = vmatprep.subr.mxu0 %v29_v18 }
  0x2c   :  { %248 = vmatpush3.msra.mxu0 %v29_v18 }
  0x2d   :  { %249 = vmatprep.subr.mxu0 %v28_v19 }
  0x2e   :  { %250 = vmatpush3.msra.mxu0 %v28_v19 }
  0x8b   :  { %v50_v22 = vpop.permute.xlu0 %49 }
  0x8c   :  { %vm54_vm0 = vcmp.eq.s32.totalorder %v45_v21, %v50_v22 }
  0x8d   :  { %251 = vmatprep.mubr.msk.f32.mxu0 %vm54_vm0, %v321_v23 }
  0x8f   :  { %v53_v24 = vpop.permute.xlu0 %52 }
  0x90   :  { %vm55_vm1 = vcmp.eq.s32.totalorder %v45_v21, %v53_v24 }
  0x91   :  { %252 = vmatmul.mubr.msk.f32.vlgmr.msra.gmra.mxu0 %vm55_vm1, %v321_v23 }
  0x94   :  { %v159_v33 = vpop.permute.xlu0 %158 }
  0x95   :  { %vm163_vm2 = vcmp.eq.s32.totalorder %v45_v21, %v159_v33 }
 0x151   :  { %v253_v25 = vpop.f32.mrf.mxu0 }
 0x152   :  { %136 = vst [vmem:[#allocation5 + $0x8] sm:$0xff] %v253_v25 }
 0x153   :  { %v126_v26 = vpop.f32.mrf.mxu0 }
 0x154   :  { %135 = vst [vmem:[#allocation5] sm:$0xff] %v126_v26  ;;  %137 = vmax.xlane.f32.xlu1 %v126_v26  ;;  %v165_v37 = vsel %vm163_vm2, %v126_v26, 0.0 }
 0x158   :  { %139 = vmax.xlane.f32.xlu1 %v253_v25 }
 0x169   :  { %161 = vperm.xlu1 %263, %v355_v4  }
 0x1dd   :  { %v138_v27 = vpop.xlane.xlu1 %137 }
 0x1de   :  { %v141_v28 = vsub.f32 %v126_v26, %v138_v27 }
 0x1e0   :  { %v143_v29 = vmul.f32 1.442695, %v141_v28 }
 0x1e1   :  { %v140_v30 = vpop.xlane.xlu1 %139 }
 0x1e2   :  { %264 = vpow2.f32 %v143_v29  ;;  %v142_v31 = vsub.f32 %v253_v25, %v140_v30 }
 0x1e4   :  { %v145_v32 = vmul.f32 1.442695, %v142_v31 }
 0x1e5   :  { %v162_v35 = vpop.permute.xlu1 %161 }
 0x1e6   :  { %266 = vpow2.f32 %v145_v32  ;;  %vm164_vm3 = vcmp.eq.s32.totalorder %v45_v21, %v162_v35 }
 0x1e7   :  { %v166_v38 = vsel %vm164_vm3, %v253_v25, 0.0 }
 0x1ef   :  { %v265_v34 = vpop.eup %264 }
 0x1f0   :  { %147 = vadd.xlane.f32.xlu0 %v265_v34 }
 0x1f3   :  { %v267_v36 = vpop.eup %266 }
 0x1f4   :  { %149 = vadd.xlane.f32.xlu1 %v267_v36  ;;  %167 = vadd.xlane.f32.xlu0 %v165_v37 }
 0x1f8   :  { %169 = vadd.xlane.f32.xlu0 %v166_v38 }
 0x1f9   :  { %303 = shalt.err (!%p300_p9)
}
 0x1fa   :  { %187 = dma.vmem_to_hbm [thread:$0]  %s182_s1, 256, %s373_s2, [#allocation4], %s317_s15, %s317_s15, %s318_s16   ;;  %vm173_vm4 = vcmask 7168  }
 0x279   :  { %v148_v39 = vpop.xlane.xlu0 %147 }
 0x27a   :  { %268 = vlog2.f32 %v148_v39 }
 0x27d   :  { %v150_v40 = vpop.xlane.xlu1 %149  ;;  %v168_v43 = vpop.xlane.xlu0 %167 }
 0x27e   :  { %270 = vlog2.f32 %v150_v40 }
 0x281   :  { %v170_v49 = vpop.xlane.xlu0 %169 }
 0x287   :  { %v269_v41 = vpop.eup %268 }
 0x288   :  { %v152_v42 = vmul.f32 0.6931472, %v269_v41 }
 0x28a   :  { %v155_v44 = vadd.f32 %v152_v42, %v138_v27 }
 0x28b   :  { %v271_v45 = vpop.eup %270 }
 0x28c   :  { %v154_v46 = vmul.f32 0.6931472, %v271_v45  ;;  %v171_v47 = vsub.f32 %v155_v44, %v168_v43 }
 0x28e   :  { %174 = vst.msk [vmem:[%s374_s3] sm:$0xff] %vm173_vm4, %v171_v47  ;;  %v156_v48 = vadd.f32 %v154_v46, %v140_v30 }
 0x290   :  { %v172_v50 = vsub.f32 %v156_v48, %v170_v49 }
 0x292   :  { %175 = vst.msk [vmem:[%s374_s3 + $0x8] sm:$0xff] %vm173_vm4, %v172_v50 }
 0x293   :  { %314 = dma.done.wait [#allocation4], 256  }
 0x294   :  { %315 = vsyncadd [#allocation4], 4294967040 }
 0x295   :  { %195 = vsyncpa [#allocation3], 1 }
 0x296   :  { %196 = vsyncpa [#allocation4], 1 }

</bundles_post_ra>
